<compile_context>
chip_gen: v7x
topology: tpu7x:2x2x1
jax: 0.10.0
libtpu: 0.0.40
codegen_flags: <defaults>
</compile_context>

<pallas_src>
import functools

import jax
import jax.numpy as jnp
from jax.experimental import pallas as pl
from jax.experimental.pallas import tpu as pltpu


def _round_up(x, m):
    return ((x + m - 1) // m) * m


def _focal_ce_partial_kernel(logits_ref, targets_ref, partial_ref, *,
                             n_rows, tile_n):
    """Writes the partial (masked) cross-entropy sum of this batch tile."""
    i = pl.program_id(0)

    raw = logits_ref[...]                                     # (tile_n, C) input dtype
    tgt = targets_ref[...]                                     # (tile_n, 1) int32
    tn, c = raw.shape

    # Target-logit gather on the raw logits: exactly one nonzero per row, so
    # the packed-dtype select + reduce is exact, and `logits - m` below stays
    # single-use (fuses into the exp->sum reduction, no multi-use f32 temp).
    col = jax.lax.broadcasted_iota(jnp.int32, (tn, c), 1)      # (tile_n, C)
    tgt_logit = jnp.sum(
        jnp.where(col == tgt, raw, jnp.zeros_like(raw)),
        axis=-1, keepdims=True).astype(jnp.float32)            # (tile_n, 1)

    # Per-row log-sum-exp (single upcast to f32).
    logits = raw.astype(jnp.float32)                           # (tile_n, C)
    m = jnp.max(logits, axis=-1, keepdims=True)                # (tile_n, 1)
    sumexp = jnp.sum(jnp.exp(logits - m), axis=-1, keepdims=True)

    # CE = logsumexp(logits) - logits[target]
    ce_per_row = jnp.log(sumexp) + m - tgt_logit               # (tile_n, 1)

    # Mask rows past the true batch size (partial last tile).  Keep this a
    # select applied BEFORE the reduction: NaN/Inf-safe for garbage padding.
    row = i * tile_n + jax.lax.broadcasted_iota(jnp.int32, (tn, 1), 0)
    valid = row < n_rows
    partial_ref[0, 0] = jnp.sum(jnp.where(valid, ce_per_row, 0.0))


def _vmem_budget():
    """Returns (target logits-tile bytes, vmem_limit_bytes) per TPU generation."""
    try:
        vmem_cap = int(pltpu.get_tpu_info().vmem_capacity_bytes)
    except Exception:
        vmem_cap = 64 * 1024 * 1024          # conservative (v7x-sized) fallback
    if vmem_cap >= 96 * 1024 * 1024:
        # v5e / v6e: 128 MiB VMEM per TensorCore — bigger tiles amortize the
        # ~0.35 us per-grid-step overhead; leave room for f32 intermediates.
        return 8 * 1024 * 1024, 64 * 1024 * 1024
    # v7x: 64 MiB VMEM per TensorCore — 2-4 MiB tiles still hit ~85%+ roofline.
    return 3 * 1024 * 1024, 32 * 1024 * 1024


def _pick_tile_rows(n, c, itemsize, target_tile_bytes):
    """Batch-tile rows sized by the real (lane-padded) VMEM footprint, rounded
    to the sublane packing granularity, and capped at ~half the batch so the
    grid has >= 2 steps to split across TensorCores."""
    padded_c = _round_up(c, 128)                 # last dim pads to 128 lanes
    row_bytes = padded_c * itemsize
    gran = 8 if itemsize >= 4 else (16 if itemsize == 2 else 32)
    rows = max(gran, (target_tile_bytes // row_bytes) // gran * gran)
    if n > 2 * gran:
        # Keep at least two grid steps so both v7x TensorCores get work.
        rows = min(rows, _round_up(pl.cdiv(n, 2), gran))
    if rows >= n:
        return n       # single full-batch tile (block == full dim: always legal)
    return rows


def focal_loss(logits, targets, *, alpha=1.0, gamma=2.0, tile_rows=None):
    """logits: (N, C) float (f32/bf16); targets: (N,) int. Returns scalar f32."""
    n, c = logits.shape
    targets2d = targets.astype(jnp.int32).reshape(n, 1)
    # TODO(synk): the (tile_n, 1) int32 targets block lane-pads 1 -> 128 in
    # VMEM; negligible next to the logits tile, kept simple per review.

    itemsize = jnp.dtype(logits.dtype).itemsize
    target_tile_bytes, vmem_limit = _vmem_budget()
    tile_n = (tile_rows if tile_rows is not None
              else _pick_tile_rows(n, c, itemsize, target_tile_bytes))
    num_tiles = pl.cdiv(n, tile_n)

    kernel = functools.partial(_focal_ce_partial_kernel,
                               n_rows=n, tile_n=tile_n)

    partials = pl.pallas_call(
        kernel,
        out_shape=jax.ShapeDtypeStruct((num_tiles, 1), jnp.float32),
        grid_spec=pltpu.PrefetchScalarGridSpec(
            num_scalar_prefetch=0,
            grid=(num_tiles,),
            in_specs=[
                # lane-dense logits tile: full C (last dim -> lanes)
                pl.BlockSpec((tile_n, c), lambda i: (i, 0)),
                # per-tile targets slice
                pl.BlockSpec((tile_n, 1), lambda i: (i, 0)),
            ],
            out_specs=pl.BlockSpec(
                (1, 1), lambda i: (i, 0), memory_space=pltpu.SMEM),
        ),
        compiler_params=pltpu.CompilerParams(
            dimension_semantics=("parallel",),
            vmem_limit_bytes=vmem_limit,
        ),
        cost_estimate=pl.CostEstimate(
            flops=6 * n * c,
            transcendentals=n * c,
            bytes_accessed=n * c * itemsize + n * 4 + num_tiles * 4,
        ),
    )(logits, targets2d)

    # tiny scalar epilogue in plain JAX: mean CE + focal transform
    ce_mean = jnp.sum(partials) / jnp.float32(n)
    return alpha * (1.0 - jnp.exp(-ce_mean)) ** gamma * ce_mean


def _reference_focal_loss(logits, targets, alpha=1.0, gamma=2.0):
    logits = logits.astype(jnp.float32)
    logz = jax.scipy.special.logsumexp(logits, axis=-1)
    tgt_logit = jnp.take_along_axis(logits, targets[:, None], axis=-1)[:, 0]
    ce = jnp.mean(logz - tgt_logit)
    return alpha * (1.0 - jnp.exp(-ce)) ** gamma * ce


if __name__ == "__main__":
    key = jax.random.PRNGKey(0)
    k1, k2, k3, k4, k5, k6 = jax.random.split(key, 6)

    # --- test 1: small f32 case (batch=8, classes=16), single tile ---
    N, C = 8, 16
    logits = jax.random.normal(k1, (N, C), dtype=jnp.float32)
    targets = jax.random.randint(k2, (N,), 0, C, dtype=jnp.int32)

    out = focal_loss(logits, targets, alpha=1.0, gamma=2.0)
    out = jax.block_until_ready(out)
    ref = _reference_focal_loss(logits, targets, alpha=1.0, gamma=2.0)
    assert jnp.allclose(out, ref, rtol=1e-5, atol=1e-5), (out, ref)

    # --- test 2: bf16 input, explicit multi-tile grid, masked partial tile ---
    N2, C2 = 200, 32
    logits2 = jax.random.normal(k3, (N2, C2), dtype=jnp.bfloat16)
    targets2 = jax.random.randint(k4, (N2,), 0, C2, dtype=jnp.int32)

    out2 = focal_loss(logits2, targets2, alpha=0.5, gamma=2.0, tile_rows=64)
    out2 = jax.block_until_ready(out2)
    ref2 = _reference_focal_loss(logits2, targets2, alpha=0.5, gamma=2.0)
    assert jnp.allclose(out2, ref2, rtol=1e-4, atol=1e-5), (out2, ref2)

    # --- test 3: automatic tile picking (>=2 tiles, masked tail), f32 ---
    N3, C3 = 300, 128
    logits3 = jax.random.normal(k5, (N3, C3), dtype=jnp.float32)
    targets3 = jax.random.randint(k6, (N3,), 0, C3, dtype=jnp.int32)

    out3 = focal_loss(logits3, targets3, alpha=1.0, gamma=2.0)
    out3 = jax.block_until_ready(out3)
    ref3 = _reference_focal_loss(logits3, targets3, alpha=1.0, gamma=2.0)
    assert jnp.allclose(out3, ref3, rtol=1e-5, atol=1e-5), (out3, ref3)

    print("KERNEL_OK")
</pallas_src>

<mosaic_0001>
module attributes {stable_mosaic.version = 11 : i64} {
  func.func @_focal_ce_partial_kernel(%arg0: i32, %arg1: memref<8x16xf32, #tpu.memory_space<vmem>>, %arg2: memref<8x1xi32, #tpu.memory_space<vmem>>, %arg3: memref<1x1xf32, #tpu.memory_space<smem>>) attributes {dimension_semantics = [#tpu.dimension_semantics<parallel>], iteration_bounds = array<i64: 1>, scalar_prefetch = 0 : i64, scratch_operands = 0 : i64, tpu.core_type = #tpu.core_type<tc>, window_params = [{transform_indices = @transform_0, window_bounds = array<i64: 8, 16>}, {transform_indices = @transform_1, window_bounds = array<i64: 8, 1>}, {transform_indices = @transform_2, window_bounds = array<i64: 1, 1>}]} {
    %c0 = arith.constant 0 : index
    %c0_0 = arith.constant 0 : index
    %0 = vector.load %arg1[%c0, %c0_0] : memref<8x16xf32, #tpu.memory_space<vmem>>, vector<8x16xf32>
    %c0_1 = arith.constant 0 : index
    %c0_2 = arith.constant 0 : index
    %1 = vector.load %arg2[%c0_1, %c0_2] : memref<8x1xi32, #tpu.memory_space<vmem>>, vector<8x1xi32>
    %2 = tpu.iota {dimensions = array<i32: 1>} : vector<8x16xi32>
    %3 = vector.broadcast %1 : vector<8x1xi32> to vector<8x16xi32>
    %4 = arith.cmpi eq, %2, %3 : vector<8x16xi32>
    %cst = arith.constant 0.000000e+00 : f32
    %5 = vector.broadcast %cst : f32 to vector<8x16xf32>
    %6 = arith.select %4, %0, %5 : vector<8x16xi1>, vector<8x16xf32>
    %cst_3 = arith.constant dense<0.000000e+00> : vector<8xf32>
    %7 = vector.multi_reduction <add>, %6, %cst_3 [1] : vector<8x16xf32> to vector<8xf32>
    %8 = vector.shape_cast %7 : vector<8xf32> to vector<8x1xf32>
    %cst_4 = arith.constant dense<0xFF800000> : vector<8xf32>
    %9 = vector.multi_reduction <maximumf>, %0, %cst_4 [1] : vector<8x16xf32> to vector<8xf32>
    %10 = vector.shape_cast %9 : vector<8xf32> to vector<8x1xf32>
    %11 = vector.broadcast %10 : vector<8x1xf32> to vector<8x16xf32>
    %12 = arith.subf %0, %11 : vector<8x16xf32>
    %13 = math.exp %12 : vector<8x16xf32>
    %cst_5 = arith.constant dense<0.000000e+00> : vector<8xf32>
    %14 = vector.multi_reduction <add>, %13, %cst_5 [1] : vector<8x16xf32> to vector<8xf32>
    %15 = vector.shape_cast %14 : vector<8xf32> to vector<8x1xf32>
    %16 = math.log %15 : vector<8x1xf32>
    %17 = arith.addf %16, %10 : vector<8x1xf32>
    %18 = arith.subf %17, %8 : vector<8x1xf32>
    %c8_i32 = arith.constant 8 : i32
    %19 = arith.muli %arg0, %c8_i32 : i32
    %20 = tpu.iota {dimensions = array<i32: 0>} : vector<8x1xi32>
    %21 = vector.broadcast %19 : i32 to vector<8x1xi32>
    %22 = arith.addi %21, %20 : vector<8x1xi32>
    %c8_i32_6 = arith.constant 8 : i32
    %23 = vector.broadcast %c8_i32_6 : i32 to vector<8x1xi32>
    %24 = arith.cmpi slt, %22, %23 : vector<8x1xi32>
    %cst_7 = arith.constant 0.000000e+00 : f32
    %25 = vector.broadcast %cst_7 : f32 to vector<8x1xf32>
    %26 = arith.select %24, %18, %25 : vector<8x1xi1>, vector<8x1xf32>
    %27 = vector.shape_cast %26 : vector<8x1xf32> to vector<1x8x1xf32>
    %cst_8 = arith.constant dense<0.000000e+00> : vector<1xf32>
    %28 = vector.multi_reduction <add>, %27, %cst_8 [1, 2] : vector<1x8x1xf32> to vector<1xf32>
    %29 = vector.shape_cast %28 : vector<1xf32> to vector<1x1x1xf32>
    %30 = vector.extract %29[0, 0, 0] : f32 from vector<1x1x1xf32>
    %c0_9 = arith.constant 0 : index
    %c0_10 = arith.constant 0 : index
    %31 = memref.load %arg3[%c0_9, %c0_10] : memref<1x1xf32, #tpu.memory_space<smem>>
    memref.store %30, %arg3[%c0_9, %c0_10] : memref<1x1xf32, #tpu.memory_space<smem>>
    return
  }
  func.func @transform_0(%arg0: i32) -> (i32, i32) {
    %c0_i32 = arith.constant 0 : i32
    %c0_i32_0 = arith.constant 0 : i32
    return %arg0, %c0_i32 : i32, i32
  }
  func.func @transform_1(%arg0: i32) -> (i32, i32) {
    %c0_i32 = arith.constant 0 : i32
    %c0_i32_0 = arith.constant 0 : i32
    return %arg0, %c0_i32 : i32, i32
  }
  func.func @transform_2(%arg0: i32) -> (i32, i32) {
    %c0_i32 = arith.constant 0 : i32
    %c0_i32_0 = arith.constant 0 : i32
    return %arg0, %c0_i32 : i32, i32
  }
}

</mosaic_0001>

<bundles_post_ra>
// kernel: tpu_custom_call.1
= control target key start
LH: loop header
LB: loop body
LE: loop exit
PB: predicated region body
PF: predicated region fallthrough
CT: control target
= control target key end

     0   :  { %vm21_vm0 = vcmask 130048   ;;  %s130_s0 = inlined_call_operand.vmem [shape: f32[8,16], index: 0, kind: input, shape index: {}]   ;;  %s131_s1 = inlined_call_operand.vmem [shape: s32[8,1], index: 1, kind: input, shape index: {}]   ;;  %s132_s2 = inlined_call_operand.hbm [shape: f32[1,1], index: 2, kind: output, shape index: {}]  }
   0x1   :  { %v12_v0 = vld [vmem:[%s130_s0] sm:$0xff] }
   0x2   :  { %7 = vsyncpa [#allocation3], 0  ;;  %v25_v1 = vsel %vm21_vm0, %v12_v0, -inf  ;;  %v92_v2 = vmov 0   ;;  %v13_v3 = vld [vmem:[%s131_s1] sm:$0xff]  ;;  %v14_v7 = vlaneseq  ;;  %vm45_vm2 = vcmask 7168  }
   0x3   :  { %75 = vset.pattern.permute.xlu0 %v92_v2  ;;  %s80_s14 = scalar_lea.hbm %s132_s2, 16 }
   0x4   :  { %26 = vmax.xlane.f32.xlu0 %v25_v1  ;;  %v15_v8 = vand.u32 127, %v14_v7  ;;  %p81_p0 = scmp.ne.s32.totalorder %s132_s2, %s80_s14  ;;  %p84_p1 = scmp.lt.u32.totalorder %s80_s14, %s132_s2 }
   0x6   :  { %p86_p2 = pnand %p84_p1, %p81_p0 }
  0x1a   :  { %17 = vperm.xlu0 %75, %v13_v3  }
  0x91   :  { %v27_v4 = vpop.xlane.xlu0 %26 }
  0x92   :  { %v28_v5 = vsub.f32 %v12_v0, %v27_v4 }
  0x94   :  { %v29_v6 = vmul.f32 1.442695, %v28_v5 }
  0x96   :  { %76 = vpow2.f32 %v29_v6 }
  0x99   :  { %v18_v9 = vpop.permute.xlu0 %17 }
  0x9a   :  { %vm19_vm1 = vcmp.eq.s32.totalorder %v15_v8, %v18_v9 }
  0x9b   :  { %v20_v11 = vsel %vm19_vm1, %v12_v0, 0.0 }
  0x9c   :  { %v22_v13 = vsel %vm21_vm0, %v20_v11, 0.0 }
  0xa0   :  { %v77_v10 = vpop.eup %76 }
  0xa1   :  { %v31_v12 = vsel %vm21_vm0, %v77_v10, 0.0 }
  0xa2   :  { %32 = vadd.xlane.f32.xlu1 %v31_v12 }
  0xa6   :  { %23 = vadd.xlane.f32.xlu1 %v22_v13 }
 0x12f   :  { %v33_v14 = vpop.xlane.xlu1 %32 }
 0x130   :  { %78 = vlog2.f32 %v33_v14 }
 0x133   :  { %v24_v17 = vpop.xlane.xlu1 %23 }
 0x13a   :  { %v79_v15 = vpop.eup %78 }
 0x13b   :  { %v35_v16 = vmul.f32 0.6931472, %v79_v15 }
 0x13d   :  { %v36_v18 = vadd.f32 %v35_v16, %v27_v4 }
 0x13f   :  { %v37_v19 = vsub.f32 %v36_v18, %v24_v17 }
 0x141   :  { %v46_v20 = vsel %vm45_vm2, %v37_v19, 0.0 }
 0x142   :  { %47 = vadd.xlane.f32.xlu1 %v46_v20 }
 0x1cf   :  { %v48_v21 = vpop.xlane.xlu1 %47 }
 0x1d0   :  { %v49_v22 = vrot.slane %v48_v21, 4 }
 0x1d2   :  { %v50_v23 = vadd.f32 %v49_v22, %v48_v21 }
 0x1d4   :  { %v51_v24 = vrot.slane %v50_v23, 2 }
 0x1d6   :  { %v52_v25 = vadd.f32 %v51_v24, %v50_v23 }
 0x1d8   :  { %v53_v26 = vrot.slane %v52_v25, 1 }
 0x1da   :  { %v54_v27 = vadd.f32 %v53_v26, %v52_v25 }
 0x1dc   :  { %71 = vpush %v54_v27 }
 0x20d   :  { %s72_s0 = spop %71 }
 0x20e   :  { %57 = sst [smem:[#allocation2]] %s72_s0 }
 0x20f   :  { %89 = shalt.err (!%p86_p2)
}
 0x210   :  { %s93_s19 = smov [#allocation2]  }
 0x211   :  { %65 = dma.smem_to_hbm %s93_s19, 16, %s132_s2, [#allocation3]  }
 0x212   :  { %90 = dma.done.wait [#allocation3], 16  }
 0x213   :  { %91 = vsyncadd [#allocation3], 4294967280 }
 0x214   :  { %69 = sfence }
 0x215   :  { %70 = vsyncpa [#allocation3], 1 }

</bundles_post_ra>
